<compile_context>
chip_gen: v6e
topology: v6e:2x2x1
jax: 0.10.0
libtpu: 0.0.40
codegen_flags: <defaults>
</compile_context>

<pallas_src>
import jax
import jax.numpy as jnp
from jax.experimental import pallas as pl
from jax.experimental.pallas import tpu as pltpu

_LANE = 128


def _round_up(n, m):
    return ((n + m - 1) // m) * m


def _decoder_kernel(w_ref, xt_ref, ot_ref):
    """VPU linear: ot[n, b] = sum_k w[n, k] * xt[k, b].

    w_ref : [N, K]     nn.Linear weight (out_features, in_features), untransposed
    xt_ref: [K, Bblk]  lane-major input (features on sublanes, batch on lanes)
    ot_ref: [N, Bblk]  lane-major output
    """
    w = w_ref[...]      # [N, K]
    xt = xt_ref[...]    # [K, Bblk]
    k_dim = w.shape[1]
    # K broadcast multiply-adds on the VPU; no MXU, lane-dense loads/stores.
    acc = w[:, 0:1] * xt[0:1, :]
    for k in range(1, k_dim):
        acc = acc + w[:, k : k + 1] * xt[k : k + 1, :]
    ot_ref[...] = acc.astype(ot_ref.dtype)


def decoder_forward(x, weight, *, block_b=512):
    """Equivalent of Decoder.forward: x @ weight.T.

    x:      [B, in_features]  float32
    weight: [out_features, in_features]  (exact nn.Linear layout, NOT transposed)
    """
    B, K = x.shape
    N, K_w = weight.shape
    assert K == K_w

    # Lane-major layout: features on sublanes, batch on the 128-wide lane axis.
    x_t = x.T  # [K, B]

    if B <= block_b:
        # Single lane-dense tile, no grid: avoids per-step pipeline overhead.
        b_pad = _round_up(max(B, 1), _LANE)
        if b_pad != B:
            x_t = jnp.pad(x_t, ((0, 0), (0, b_pad - B)))
        out_t = pl.pallas_call(
            _decoder_kernel,
            out_shape=jax.ShapeDtypeStruct((N, b_pad), x.dtype),
            in_specs=[
                pl.BlockSpec(memory_space=pltpu.MemorySpace.VMEM),
                pl.BlockSpec(memory_space=pltpu.MemorySpace.VMEM),
            ],
            out_specs=pl.BlockSpec(memory_space=pltpu.MemorySpace.VMEM),
        )(weight, x_t)
    else:
        # Tile the batch (lane) axis with lane-dense blocks; axis is
        # embarrassingly parallel, so mark it "parallel" for megacore / v7x.
        b_pad = _round_up(B, block_b)
        if b_pad != B:
            x_t = jnp.pad(x_t, ((0, 0), (0, b_pad - B)))
        grid = (b_pad // block_b,)
        out_t = pl.pallas_call(
            _decoder_kernel,
            out_shape=jax.ShapeDtypeStruct((N, b_pad), x.dtype),
            grid=grid,
            in_specs=[
                pl.BlockSpec((N, K), lambda i: (0, 0)),        # weight stays resident
                pl.BlockSpec((K, block_b), lambda i: (0, i)),  # lane-major x blocks
            ],
            out_specs=pl.BlockSpec((N, block_b), lambda i: (0, i)),
            compiler_params=pltpu.CompilerParams(
                dimension_semantics=("parallel",),
            ),
        )(weight, x_t)

    # Back to PyTorch's [batch, out_features] convention.
    return out_t[:, :B].T


if __name__ == "__main__":
    key = jax.random.PRNGKey(0)
    kx, kx2, kw = jax.random.split(key, 3)

    # nn.Linear(3, 3, bias=False) weight: [out_features, in_features].
    weight = jax.random.uniform(
        kw, (3, 3), dtype=jnp.float32, minval=-1.0, maxval=1.0
    )

    # Small batch: exercises the gridless lane-dense path.
    x_small = jax.random.normal(kx, (8, 3), dtype=jnp.float32)
    out_small = jax.block_until_ready(decoder_forward(x_small, weight))
    ref_small = x_small @ weight.T
    assert out_small.shape == (8, 3)
    assert jnp.allclose(out_small, ref_small, atol=1e-5, rtol=1e-5)

    # Larger batch: exercises the tiled ("parallel") path incl. lane padding.
    x_large = jax.random.normal(kx2, (640, 3), dtype=jnp.float32)
    out_large = jax.block_until_ready(decoder_forward(x_large, weight))
    ref_large = x_large @ weight.T
    assert out_large.shape == (640, 3)
    assert jnp.allclose(out_large, ref_large, atol=1e-5, rtol=1e-5)

    print("KERNEL_OK")
</pallas_src>

<mosaic_0001>
module attributes {stable_mosaic.version = 11 : i64} {
  func.func @_decoder_kernel(%arg0: memref<3x3xf32, #tpu.memory_space<vmem>>, %arg1: memref<3x128xf32, #tpu.memory_space<vmem>>, %arg2: memref<3x128xf32, #tpu.memory_space<vmem>>) attributes {dimension_semantics = [], scalar_prefetch = 0 : i64, scratch_operands = 0 : i64, tpu.core_type = #tpu.core_type<tc>} {
    %c0 = arith.constant 0 : index
    %c0_0 = arith.constant 0 : index
    %0 = vector.load %arg0[%c0, %c0_0] : memref<3x3xf32, #tpu.memory_space<vmem>>, vector<3x3xf32>
    %c0_1 = arith.constant 0 : index
    %c0_2 = arith.constant 0 : index
    %1 = vector.load %arg1[%c0_1, %c0_2] : memref<3x128xf32, #tpu.memory_space<vmem>>, vector<3x128xf32>
    %2 = vector.extract_strided_slice %0 {offsets = [0, 0], sizes = [3, 1], strides = [1, 1]} : vector<3x3xf32> to vector<3x1xf32>
    %3 = vector.extract_strided_slice %1 {offsets = [0, 0], sizes = [1, 128], strides = [1, 1]} : vector<3x128xf32> to vector<1x128xf32>
    %4 = vector.broadcast %2 : vector<3x1xf32> to vector<3x128xf32>
    %5 = vector.broadcast %3 : vector<1x128xf32> to vector<3x128xf32>
    %6 = arith.mulf %4, %5 : vector<3x128xf32>
    %7 = vector.extract_strided_slice %0 {offsets = [0, 1], sizes = [3, 1], strides = [1, 1]} : vector<3x3xf32> to vector<3x1xf32>
    %8 = vector.extract_strided_slice %1 {offsets = [1, 0], sizes = [1, 128], strides = [1, 1]} : vector<3x128xf32> to vector<1x128xf32>
    %9 = vector.broadcast %7 : vector<3x1xf32> to vector<3x128xf32>
    %10 = vector.broadcast %8 : vector<1x128xf32> to vector<3x128xf32>
    %11 = arith.mulf %9, %10 : vector<3x128xf32>
    %12 = arith.addf %6, %11 : vector<3x128xf32>
    %13 = vector.extract_strided_slice %0 {offsets = [0, 2], sizes = [3, 1], strides = [1, 1]} : vector<3x3xf32> to vector<3x1xf32>
    %14 = vector.extract_strided_slice %1 {offsets = [2, 0], sizes = [1, 128], strides = [1, 1]} : vector<3x128xf32> to vector<1x128xf32>
    %15 = vector.broadcast %13 : vector<3x1xf32> to vector<3x128xf32>
    %16 = vector.broadcast %14 : vector<1x128xf32> to vector<3x128xf32>
    %17 = arith.mulf %15, %16 : vector<3x128xf32>
    %18 = arith.addf %12, %17 : vector<3x128xf32>
    %c0_3 = arith.constant 0 : index
    %c0_4 = arith.constant 0 : index
    %19 = vector.load %arg2[%c0_3, %c0_4] : memref<3x128xf32, #tpu.memory_space<vmem>>, vector<3x128xf32>
    tpu.vector_store %arg2[%c0_3, %c0_4], %18 {strides = array<i32>} : memref<3x128xf32, #tpu.memory_space<vmem>>, vector<3x128xf32>,
    return
  }
}

</mosaic_0001>

<bundles_post_ra>
// kernel: tpu_custom_call.1
= control target key start
LH: loop header
LB: loop body
LE: loop exit
PB: predicated region body
PF: predicated region fallthrough
CT: control target
= control target key end

     0   :  { %7 = vsyncpa [#allocation3], 0  ;;  %s191_s0 = inlined_call_operand.hbm [shape: f32[3,3], index: 0, kind: input, shape index: {}]   ;;  %s192_s1 = inlined_call_operand.hbm [shape: f32[3,128], index: 1, kind: input, shape index: {}]   ;;  %s193_s2 = inlined_call_operand.hbm [shape: f32[3,128], index: 2, kind: output, shape index: {}]  }
   0x1   :  { %8 = vsyncpa [#allocation6], 0 }
   0x2   :  { %9 = vsyncpa [#allocation4], 0  ;;  %s161_s9 = smov [#allocation2]   ;;  %s162_s11 = smov [#allocation5]  }
   0x3   :  { %s16_s10 = sshll.u32 %s161_s9, 4  ;;  %s26_s12 = sshll.u32 %s162_s11, 4  ;;  %s17_s10 = int_to_ptr.vmem [resolvable:$true] %s16_s10  ;;  %s27_s12 = int_to_ptr.vmem [resolvable:$true] %s26_s12 }
   0x4   :  { %s103_s13 = scalar_lea.vmem %s17_s10, 64  ;;  %p108_p1 = scmp.lt.s32.totalorder %s17_s10, %s17_s10 }
   0x5   :  { %p104_p0 = scmp.ne.s32.totalorder %s17_s10, %s103_s13  ;;  %p109_p2 = scmp.lt.s32.totalorder %s103_s13, %s103_s13 }
   0x7   :  { %p110_p3 = por %p109_p2, %p108_p1 }
   0x9   :  { %p111_p4 = pnand %p110_p3, %p104_p0 }
   0xb   :  { %114 = shalt.err (!%p111_p4)
}
   0xc   :  { %19 = dma.hbm_to_vmem [thread:$0]  %s191_s0, 64, %s17_s10, [#allocation3]  }
   0xd   :  { %s123_s16 = scalar_lea.vmem %s27_s12, 64  ;;  %p128_p6 = scmp.lt.s32.totalorder %s27_s12, %s27_s12 }
   0xe   :  { %p124_p5 = scmp.ne.s32.totalorder %s27_s12, %s123_s16  ;;  %p129_p7 = scmp.lt.s32.totalorder %s123_s16, %s123_s16 }
  0x10   :  { %p130_p8 = por %p129_p7, %p128_p6 }
  0x12   :  { %p131_p9 = pnand %p130_p8, %p124_p5 }
  0x14   :  { %134 = shalt.err (!%p131_p9)
}
  0x15   :  { %29 = dma.hbm_to_vmem [thread:$0]  %s192_s1, 64, %s27_s12, [#allocation6]  }
  0x16   :  { %155 = dma.done.wait [#allocation3], 64  }
  0x17   :  { %156 = vsyncadd [#allocation3], 4294967232 }
  0x18   :  { %157 = dma.done.wait [#allocation6], 64  }
  0x19   :  { %158 = vsyncadd [#allocation6], 4294967232  ;;  %v163_v0 = vmov 0   ;;  %v164_v1 = vmov 2   ;;  %v36_v2 = vld [vmem:[#allocation2] sm:$0x7]  ;;  %v43_v4 = vlaneseq }
  0x1a   :  { %91 = vset.pattern.permute.xlu0 %v163_v0  ;;  %93 = vset.pattern.permute.xlu1 %v164_v1  ;;  %v165_v3 = vmov 1   ;;  %v37_v9 = vld [vmem:[#allocation5] sm:$0x7]  ;;  %s166_s0 = smov [#allocation7]  }
  0x1b   :  { %40 = vperm.xlu0 %91, %v36_v2   ;;  %59 = vperm.xlu1 %93, %v36_v2   ;;  %v44_v5 = vshrl.u32 %v43_v4, 7  ;;  %s75_s1 = sshll.u32 %s166_s0, 4  ;;  %s76_s1 = int_to_ptr.vmem [resolvable:$true] %s75_s1 }
  0x1c   :  { %s135_s19 = scalar_lea.vmem %s76_s1, 64  ;;  %p140_p11 = scmp.lt.s32.totalorder %s76_s1, %s76_s1 }
  0x1d   :  { %v45_v6 = vsub.s32 0, %v44_v5  ;;  %v54_v7 = vsub.s32 1, %v44_v5  ;;  %v64_v8 = vsub.s32 2, %v44_v5  ;;  %p136_p10 = scmp.ne.s32.totalorder %s76_s1, %s135_s19  ;;  %p141_p12 = scmp.lt.s32.totalorder %s135_s19, %s135_s19 }
  0x1f   :  { %92 = vset.pattern.permute.xlu0 %v165_v3  ;;  %v46_v11 = vrot.slane %v37_v9, %v45_v6  ;;  %v55_v12 = vrot.slane %v37_v9, %v54_v7  ;;  %v65_v13 = vrot.slane %v37_v9, %v64_v8  ;;  %p142_p13 = por %p141_p12, %p140_p11 }
  0x20   :  { %49 = vperm.xlu0 %92, %v36_v2  }
  0x21   :  { %p143_p0 = pnand %p142_p13, %p136_p10 }
  0x24   :  { %94 = vset.pattern.permute.xlu0 %v164_v1 }
  0x96   :  { %v41_v10 = vpop.permute.xlu0 %40  ;;  %v60_v14 = vpop.permute.xlu1 %59 }
  0x97   :  { %v47_v16 = vmul.f32 %v46_v11, %v41_v10  ;;  %v66_v18 = vmul.f32 %v65_v13, %v60_v14 }
  0x9b   :  { %v50_v15 = vpop.permute.xlu0 %49 }
  0x9c   :  { %v56_v17 = vmul.f32 %v55_v12, %v50_v15 }
  0x9e   :  { %v57_v19 = vadd.f32 %v56_v17, %v47_v16 }
  0xa0   :  { %v67_v20 = vadd.f32 %v66_v18, %v57_v19 }
  0xa2   :  { %68 = vst [vmem:[#allocation7] sm:$0x7] %v67_v20 }
  0xa3   :  { %146 = shalt.err (!%p143_p0)
}
  0xa4   :  { %78 = dma.vmem_to_hbm [thread:$0]  %s76_s1, 64, %s193_s2, [#allocation4]  }
  0xa5   :  { %159 = dma.done.wait [#allocation4], 64  }
  0xa6   :  { %160 = vsyncadd [#allocation4], 4294967232 }
  0xa7   :  { %82 = vsyncpa [#allocation3], 1 }
  0xa8   :  { %83 = vsyncpa [#allocation6], 1 }
  0xa9   :  { %84 = vsyncpa [#allocation4], 1 }

</bundles_post_ra>
